<compile_context>
chip_gen: v7x
topology: tpu7x:2x2x1
jax: 0.10.0
libtpu: 0.0.40
codegen_flags: <defaults>
</compile_context>

<pallas_src>
import jax
import jax.numpy as jnp
from jax.experimental import pallas as pl
from jax.experimental.pallas import tpu as pltpu

nb_actions = 2
nb_observations = 4
HID1, HID2, FEAT = 64, 64, 32


# ----------------------------------------------------------------------------
# Kernel
# ----------------------------------------------------------------------------
def dueling_q_kernel(x_ref, w1_ref, b1_ref, w2_ref, b2_ref, w3_ref, b3_ref,
                     wq_ref, bq_ref, out_ref):
    cdt = w1_ref.dtype  # MXU input dtype (bfloat16); accumulation is f32.

    x = x_ref[...]

    # trunk: Linear(4,64) -> ReLU -> Linear(64,64) -> ReLU -> Linear(64,32)
    h = jnp.dot(x, w1_ref[...], preferred_element_type=jnp.float32) + b1_ref[...]
    h = jnp.maximum(h, 0.0)
    h = jnp.dot(h.astype(cdt), w2_ref[...], preferred_element_type=jnp.float32) + b2_ref[...]
    h = jnp.maximum(h, 0.0)
    f = jnp.dot(h.astype(cdt), w3_ref[...], preferred_element_type=jnp.float32) + b3_ref[...]

    # both heads apply ReLU first (nn.ReLU() is the first layer of each head)
    fr = jnp.maximum(f, 0.0)

    # Folded dueling head: single dot replaces adv/val matmuls + mean + broadcasts.
    # TODO(synk): output last dim is nb_actions=2 (<128 lanes) -> masked vst; a
    # lane-dense padded output slab is a further (moderate) store-side win.
    out_ref[...] = (jnp.dot(fr.astype(cdt), wq_ref[...],
                            preferred_element_type=jnp.float32)
                    + bq_ref[...]).astype(out_ref.dtype)


# ----------------------------------------------------------------------------
# Wrapper
# ----------------------------------------------------------------------------
def fold_dueling_head(wa, ba, wv, bv):
    """Exact algebraic fold of Q = V + A - mean(A) into one (FEAT, nA) weight."""
    nA = wa.shape[1]
    center = jnp.eye(nA, dtype=jnp.float32) - jnp.full((nA, nA), 1.0 / nA, jnp.float32)
    ones_row = jnp.ones((1, nA), jnp.float32)
    wq = wa @ center + wv @ ones_row        # (FEAT, nA)
    bq = ba @ center + bv @ ones_row        # (1, nA)
    return wq, bq


def _cost_estimate(B, compute_bytes):
    per_row_flops = 2 * (nb_observations * HID1 + HID1 * HID2 + HID2 * FEAT
                         + FEAT * nb_actions)
    w_elems = (nb_observations * HID1 + HID1 * HID2 + HID2 * FEAT
               + FEAT * nb_actions)
    b_elems = HID1 + HID2 + FEAT + nb_actions
    bytes_accessed = (B * nb_observations * compute_bytes      # streamed x tiles
                      + B * nb_actions * 4                     # f32 output
                      + w_elems * compute_bytes + b_elems * 4)  # resident params
    return pl.CostEstimate(flops=per_row_flops * B, transcendentals=0,
                           bytes_accessed=bytes_accessed)


def dueling_q_forward(x, params, *, tb=256, compute_dtype=jnp.bfloat16):
    """Batched dueling-Q forward.  tb: batch tile (multiple of 8; 256 is MXU-friendly)."""
    B = x.shape[0]
    w1, b1, w2, b2, w3, b3, wa, ba, wv, bv = params

    # Fold the dueling head once at wrapper level (tiny; fold ahead-of-time in
    # a real training loop).
    wq, bq = fold_dueling_head(wa, ba, wv, bv)

    # bf16 weights / activations into the MXU, f32 biases and output.
    xc = x.astype(compute_dtype)
    w1c, w2c, w3c, wqc = (w.astype(compute_dtype) for w in (w1, w2, w3, wq))
    b1f, b2f, b3f, bqf = (b.astype(jnp.float32) for b in (b1, b2, b3, bq))
    args = (xc, w1c, b1f, w2c, b2f, w3c, b3f, wqc, bqf)

    tb = min(tb, B)
    grid = (pl.cdiv(B, tb),)

    def _resident(a):  # weights/biases: constant index -> DMA'd once, VMEM-resident
        return pl.BlockSpec(a.shape, lambda i: (0, 0))

    in_specs = [pl.BlockSpec((tb, nb_observations), lambda i: (i, 0))]
    in_specs += [_resident(a) for a in args[1:]]

    return pl.pallas_call(
        dueling_q_kernel,
        out_shape=jax.ShapeDtypeStruct((B, nb_actions), jnp.float32),
        grid_spec=pl.GridSpec(
            grid=grid,
            in_specs=in_specs,
            out_specs=pl.BlockSpec((tb, nb_actions), lambda i: (i, 0)),
        ),
        compiler_params=pltpu.CompilerParams(
            dimension_semantics=("parallel",)),   # shard batch tiles across TCs (v7x)
        cost_estimate=_cost_estimate(B, jnp.dtype(compute_dtype).itemsize),
    )(*args)


# ----------------------------------------------------------------------------
# Params + references
# ----------------------------------------------------------------------------
def init_params(key):
    """Deterministic PyTorch-style (Kaiming-uniform-ish) init."""
    def linear(key, fan_in, fan_out):
        kw, kb = jax.random.split(key)
        bound = 1.0 / jnp.sqrt(fan_in)
        w = jax.random.uniform(kw, (fan_in, fan_out), jnp.float32, -bound, bound)
        b = jax.random.uniform(kb, (1, fan_out), jnp.float32, -bound, bound)
        return w, b

    k1, k2, k3, ka, kv = jax.random.split(key, 5)
    w1, b1 = linear(k1, nb_observations, HID1)
    w2, b2 = linear(k2, HID1, HID2)
    w3, b3 = linear(k3, HID2, FEAT)
    wa, ba = linear(ka, FEAT, nb_actions)
    wv, bv = linear(kv, FEAT, 1)
    return (w1, b1, w2, b2, w3, b3, wa, ba, wv, bv)


def reference_forward_f32(x, params):
    """Pure-JAX f32 reference of the original PyTorch semantics."""
    w1, b1, w2, b2, w3, b3, wa, ba, wv, bv = params
    h = jnp.maximum(x @ w1 + b1, 0.0)
    h = jnp.maximum(h @ w2 + b2, 0.0)
    f = h @ w3 + b3
    fr = jnp.maximum(f, 0.0)
    adv = fr @ wa + ba
    val = fr @ wv + bv
    return val + adv - jnp.mean(adv, axis=1, keepdims=True)


def reference_forward_matched(x, params, compute_dtype=jnp.bfloat16):
    """Pure-JAX reference with the same folding + bf16 casts as the kernel path."""
    w1, b1, w2, b2, w3, b3, wa, ba, wv, bv = params
    wq, bq = fold_dueling_head(wa, ba, wv, bv)
    c = compute_dtype
    h = jnp.dot(x.astype(c), w1.astype(c), preferred_element_type=jnp.float32) + b1
    h = jnp.maximum(h, 0.0)
    h = jnp.dot(h.astype(c), w2.astype(c), preferred_element_type=jnp.float32) + b2
    h = jnp.maximum(h, 0.0)
    f = jnp.dot(h.astype(c), w3.astype(c), preferred_element_type=jnp.float32) + b3
    fr = jnp.maximum(f, 0.0)
    return jnp.dot(fr.astype(c), wq.astype(c), preferred_element_type=jnp.float32) + bq


# ----------------------------------------------------------------------------
if __name__ == "__main__":
    key = jax.random.PRNGKey(0)
    kx, kp = jax.random.split(key)

    B = 256  # small demo batch; tiled as 2 x 128
    x = jax.random.normal(kx, (B, nb_observations), jnp.float32)
    params = init_params(kp)

    out = jax.block_until_ready(dueling_q_forward(x, params, tb=128))
    assert out.shape == (B, nb_actions)

    # Tight check against a pure-JAX path with identical precision/folding.
    ref_matched = reference_forward_matched(x, params)
    assert jnp.allclose(out, ref_matched, atol=2e-3, rtol=2e-3), \
        float(jnp.max(jnp.abs(out - ref_matched)))

    # Loose check against the original full-f32 semantics (bf16 rounding only).
    ref_f32 = reference_forward_f32(x, params)
    assert jnp.allclose(out, ref_f32, atol=1e-1, rtol=1e-1), \
        float(jnp.max(jnp.abs(out - ref_f32)))

    print("KERNEL_OK")
</pallas_src>

<mosaic_0001>
module attributes {stable_mosaic.version = 11 : i64} {
  func.func @dueling_q_kernel(%arg0: i32, %arg1: memref<128x4xbf16, #tpu.memory_space<vmem>>, %arg2: memref<4x64xbf16, #tpu.memory_space<vmem>>, %arg3: memref<1x64xf32, #tpu.memory_space<vmem>>, %arg4: memref<64x64xbf16, #tpu.memory_space<vmem>>, %arg5: memref<1x64xf32, #tpu.memory_space<vmem>>, %arg6: memref<64x32xbf16, #tpu.memory_space<vmem>>, %arg7: memref<1x32xf32, #tpu.memory_space<vmem>>, %arg8: memref<32x2xbf16, #tpu.memory_space<vmem>>, %arg9: memref<1x2xf32, #tpu.memory_space<vmem>>, %arg10: memref<128x2xf32, #tpu.memory_space<vmem>>) attributes {dimension_semantics = [#tpu.dimension_semantics<parallel>], iteration_bounds = array<i64: 2>, scalar_prefetch = 0 : i64, scratch_operands = 0 : i64, tpu.core_type = #tpu.core_type<tc>, window_params = [{transform_indices = @transform_0, window_bounds = array<i64: 128, 4>}, {pipeline_mode = #tpu.pipeline_mode<synchronous>, transform_indices = @transform_1, window_bounds = array<i64: 4, 64>}, {pipeline_mode = #tpu.pipeline_mode<synchronous>, transform_indices = @transform_2, window_bounds = array<i64: 1, 64>}, {pipeline_mode = #tpu.pipeline_mode<synchronous>, transform_indices = @transform_3, window_bounds = array<i64: 64, 64>}, {pipeline_mode = #tpu.pipeline_mode<synchronous>, transform_indices = @transform_4, window_bounds = array<i64: 1, 64>}, {pipeline_mode = #tpu.pipeline_mode<synchronous>, transform_indices = @transform_5, window_bounds = array<i64: 64, 32>}, {pipeline_mode = #tpu.pipeline_mode<synchronous>, transform_indices = @transform_6, window_bounds = array<i64: 1, 32>}, {pipeline_mode = #tpu.pipeline_mode<synchronous>, transform_indices = @transform_7, window_bounds = array<i64: 32, 2>}, {pipeline_mode = #tpu.pipeline_mode<synchronous>, transform_indices = @transform_8, window_bounds = array<i64: 1, 2>}, {transform_indices = @transform_9, window_bounds = array<i64: 128, 2>}]} {
    %c0 = arith.constant 0 : index
    %c0_0 = arith.constant 0 : index
    %0 = vector.load %arg1[%c0, %c0_0] : memref<128x4xbf16, #tpu.memory_space<vmem>>, vector<128x4xbf16>
    %c0_1 = arith.constant 0 : index
    %c0_2 = arith.constant 0 : index
    %1 = vector.load %arg2[%c0_1, %c0_2] : memref<4x64xbf16, #tpu.memory_space<vmem>>, vector<4x64xbf16>
    %cst = arith.constant dense<0.000000e+00> : vector<128x64xf32>
    %2 = tpu.matmul %0, %1, %cst {dimension_numbers = #tpu.dot_dimension_numbers<[1], [0], [0], [1], [0, 0, 1, 1], [], []>} : vector<128x4xbf16>, vector<4x64xbf16>, vector<128x64xf32> -> vector<128x64xf32>
    %c0_3 = arith.constant 0 : index
    %c0_4 = arith.constant 0 : index
    %3 = vector.load %arg3[%c0_3, %c0_4] : memref<1x64xf32, #tpu.memory_space<vmem>>, vector<1x64xf32>
    %4 = vector.broadcast %3 : vector<1x64xf32> to vector<128x64xf32>
    %5 = arith.addf %2, %4 : vector<128x64xf32>
    %cst_5 = arith.constant 0.000000e+00 : f32
    %6 = vector.broadcast %cst_5 : f32 to vector<128x64xf32>
    %7 = arith.maximumf %5, %6 : vector<128x64xf32>
    %8 = arith.truncf %7 : vector<128x64xf32> to vector<128x64xbf16>
    %c0_6 = arith.constant 0 : index
    %c0_7 = arith.constant 0 : index
    %9 = vector.load %arg4[%c0_6, %c0_7] : memref<64x64xbf16, #tpu.memory_space<vmem>>, vector<64x64xbf16>
    %cst_8 = arith.constant dense<0.000000e+00> : vector<128x64xf32>
    %10 = tpu.matmul %8, %9, %cst_8 {dimension_numbers = #tpu.dot_dimension_numbers<[1], [0], [0], [1], [0, 0, 1, 1], [], []>} : vector<128x64xbf16>, vector<64x64xbf16>, vector<128x64xf32> -> vector<128x64xf32>
    %c0_9 = arith.constant 0 : index
    %c0_10 = arith.constant 0 : index
    %11 = vector.load %arg5[%c0_9, %c0_10] : memref<1x64xf32, #tpu.memory_space<vmem>>, vector<1x64xf32>
    %12 = vector.broadcast %11 : vector<1x64xf32> to vector<128x64xf32>
    %13 = arith.addf %10, %12 : vector<128x64xf32>
    %cst_11 = arith.constant 0.000000e+00 : f32
    %14 = vector.broadcast %cst_11 : f32 to vector<128x64xf32>
    %15 = arith.maximumf %13, %14 : vector<128x64xf32>
    %16 = arith.truncf %15 : vector<128x64xf32> to vector<128x64xbf16>
    %c0_12 = arith.constant 0 : index
    %c0_13 = arith.constant 0 : index
    %17 = vector.load %arg6[%c0_12, %c0_13] : memref<64x32xbf16, #tpu.memory_space<vmem>>, vector<64x32xbf16>
    %cst_14 = arith.constant dense<0.000000e+00> : vector<128x32xf32>
    %18 = tpu.matmul %16, %17, %cst_14 {dimension_numbers = #tpu.dot_dimension_numbers<[1], [0], [0], [1], [0, 0, 1, 1], [], []>} : vector<128x64xbf16>, vector<64x32xbf16>, vector<128x32xf32> -> vector<128x32xf32>
    %c0_15 = arith.constant 0 : index
    %c0_16 = arith.constant 0 : index
    %19 = vector.load %arg7[%c0_15, %c0_16] : memref<1x32xf32, #tpu.memory_space<vmem>>, vector<1x32xf32>
    %20 = vector.broadcast %19 : vector<1x32xf32> to vector<128x32xf32>
    %21 = arith.addf %18, %20 : vector<128x32xf32>
    %cst_17 = arith.constant 0.000000e+00 : f32
    %22 = vector.broadcast %cst_17 : f32 to vector<128x32xf32>
    %23 = arith.maximumf %21, %22 : vector<128x32xf32>
    %24 = arith.truncf %23 : vector<128x32xf32> to vector<128x32xbf16>
    %c0_18 = arith.constant 0 : index
    %c0_19 = arith.constant 0 : index
    %25 = vector.load %arg8[%c0_18, %c0_19] : memref<32x2xbf16, #tpu.memory_space<vmem>>, vector<32x2xbf16>
    %cst_20 = arith.constant dense<0.000000e+00> : vector<128x2xf32>
    %26 = tpu.matmul %24, %25, %cst_20 {dimension_numbers = #tpu.dot_dimension_numbers<[1], [0], [0], [1], [0, 0, 1, 1], [], []>} : vector<128x32xbf16>, vector<32x2xbf16>, vector<128x2xf32> -> vector<128x2xf32>
    %c0_21 = arith.constant 0 : index
    %c0_22 = arith.constant 0 : index
    %27 = vector.load %arg9[%c0_21, %c0_22] : memref<1x2xf32, #tpu.memory_space<vmem>>, vector<1x2xf32>
    %28 = vector.broadcast %27 : vector<1x2xf32> to vector<128x2xf32>
    %29 = arith.addf %26, %28 : vector<128x2xf32>
    %c0_23 = arith.constant 0 : index
    %c0_24 = arith.constant 0 : index
    %30 = vector.load %arg10[%c0_23, %c0_24] : memref<128x2xf32, #tpu.memory_space<vmem>>, vector<128x2xf32>
    tpu.vector_store %arg10[%c0_23, %c0_24], %29 {strides = array<i32>} : memref<128x2xf32, #tpu.memory_space<vmem>>, vector<128x2xf32>,
    return
  }
  func.func @transform_0(%arg0: i32) -> (i32, i32) {
    %c0_i32 = arith.constant 0 : i32
    %c0_i32_0 = arith.constant 0 : i32
    return %arg0, %c0_i32 : i32, i32
  }
  func.func @transform_1(%arg0: i32) -> (i32, i32) {
    %c0_i32 = arith.constant 0 : i32
    %c0_i32_0 = arith.constant 0 : i32
    %c0_i32_1 = arith.constant 0 : i32
    return %c0_i32, %c0_i32_0 : i32, i32
  }
  func.func @transform_2(%arg0: i32) -> (i32, i32) {
    %c0_i32 = arith.constant 0 : i32
    %c0_i32_0 = arith.constant 0 : i32
    %c0_i32_1 = arith.constant 0 : i32
    return %c0_i32, %c0_i32_0 : i32, i32
  }
  func.func @transform_3(%arg0: i32) -> (i32, i32) {
    %c0_i32 = arith.constant 0 : i32
    %c0_i32_0 = arith.constant 0 : i32
    %c0_i32_1 = arith.constant 0 : i32
    return %c0_i32, %c0_i32_0 : i32, i32
  }
  func.func @transform_4(%arg0: i32) -> (i32, i32) {
    %c0_i32 = arith.constant 0 : i32
    %c0_i32_0 = arith.constant 0 : i32
    %c0_i32_1 = arith.constant 0 : i32
    return %c0_i32, %c0_i32_0 : i32, i32
  }
  func.func @transform_5(%arg0: i32) -> (i32, i32) {
    %c0_i32 = arith.constant 0 : i32
    %c0_i32_0 = arith.constant 0 : i32
    %c0_i32_1 = arith.constant 0 : i32
    return %c0_i32, %c0_i32_0 : i32, i32
  }
  func.func @transform_6(%arg0: i32) -> (i32, i32) {
    %c0_i32 = arith.constant 0 : i32
    %c0_i32_0 = arith.constant 0 : i32
    %c0_i32_1 = arith.constant 0 : i32
    return %c0_i32, %c0_i32_0 : i32, i32
  }
  func.func @transform_7(%arg0: i32) -> (i32, i32) {
    %c0_i32 = arith.constant 0 : i32
    %c0_i32_0 = arith.constant 0 : i32
    %c0_i32_1 = arith.constant 0 : i32
    return %c0_i32, %c0_i32_0 : i32, i32
  }
  func.func @transform_8(%arg0: i32) -> (i32, i32) {
    %c0_i32 = arith.constant 0 : i32
    %c0_i32_0 = arith.constant 0 : i32
    %c0_i32_1 = arith.constant 0 : i32
    return %c0_i32, %c0_i32_0 : i32, i32
  }
  func.func @transform_9(%arg0: i32) -> (i32, i32) {
    %c0_i32 = arith.constant 0 : i32
    %c0_i32_0 = arith.constant 0 : i32
    return %arg0, %c0_i32 : i32, i32
  }
}

</mosaic_0001>

<bundles_post_ra>
// kernel: tpu_custom_call.1
= control target key start
LH: loop header
LB: loop body
LE: loop exit
PB: predicated region body
PF: predicated region fallthrough
CT: control target
= control target key end

     0   :  { %s1417_s30 = smov 0   ;;  %s1549_s0 = inlined_call_operand.vmem [shape: bf16[256,4], index: 0, kind: input, shape index: {}]   ;;  %s1550_s1 = inlined_call_operand.vmem [shape: bf16[4,64], index: 1, kind: input, shape index: {}]   ;;  %s1551_s2 = inlined_call_operand.vmem [shape: f32[1,64], index: 2, kind: input, shape index: {}]   ;;  %s1552_s3 = inlined_call_operand.vmem [shape: bf16[64,64], index: 3, kind: input, shape index: {}]   ;;  %s1553_s4 = inlined_call_operand.vmem [shape: f32[1,64], index: 4, kind: input, shape index: {}]   ;;  %s1554_s5 = inlined_call_operand.vmem [shape: bf16[64,32], index: 5, kind: input, shape index: {}]   ;;  %s1555_s6 = inlined_call_operand.vmem [shape: f32[1,32], index: 6, kind: input, shape index: {}]   ;;  %s1556_s7 = inlined_call_operand.vmem [shape: bf16[32,2], index: 7, kind: input, shape index: {}]   ;;  %s1557_s8 = inlined_call_operand.vmem [shape: f32[1,2], index: 8, kind: input, shape index: {}]   ;;  %s1558_s9 = inlined_call_operand.vmem [shape: f32[256,2], index: 9, kind: output, shape index: {}]  }
   0x1 LB: > { %s1138_s10 = sadd.s32 4294967295, %s1365_s30   ;;  %p1142_p0 = scmp.ge.s32.totalorder %s1365_s30, 1  ;;  %s1365_s30 = sphi %s1417_s30, %s19_s30  }
   0x2   : > { %p288_p1 = scmp.lt.s32.totalorder %s1365_s30, 3 }
   0x4   : > { %p289_p2 = pnand %p1142_p0, %p288_p1 }
   0x5   : > { %v353_v0 = vld [vmem:[%s1550_s1] sm:$0x3] (!%p289_p2)  ;;  %vm426_vm0 = vcmask (!%p289_p2), 1041408   ;;  %s1143_s13 = sshll.u32 (!%p289_p2), %s1138_s10, 4  ;;  %v1350_v3 = vld [vmem:[%s1552_s3 + $0x8] sm:$0xff] (!%p289_p2)   ;;  %vm401_vm1 = vcmask (!%p289_p2), 31744  }
   0x6   : > { %292 = sbr.rel (%p289_p2) target bundleno = 926 (0x39e), region = 56  ;;  %v1349_v1 = vld [vmem:[%s1552_s3] sm:$0xff] (!%p289_p2)   ;;  %1332 = vmatprep.subr.msk.bf16.mxu0 (!%p289_p2), %vm426_vm0, %v353_v0  ;;  %v428_v2 = vsel (!%p289_p2), %vm426_vm0, %v353_v0, 0  ;;  %p325_p3 = scmp.lt.s32.totalorder (!%p289_p2), %s1143_s13, 31  ;;  %v1351_v12 = vld [vmem:[%s1552_s3 + $0x10] sm:$0xff] (!%p289_p2)   ;;  %v1352_v13 = vld [vmem:[%s1552_s3 + $0x18] sm:$0xff] (!%p289_p2)  }
   0x7   : > { %1247 = vmatpush3.bf16.msra.mxu0 (!%p289_p2), %v428_v2  ;;  %1264 = vmatprep.subr.bf16.mxu1 (!%p289_p2), %v1349_v1  ;;  %v1353_v14 = vld [vmem:[%s1554_s5] sm:$0xff] (!%p289_p2)   ;;  %v1354_v15 = vld [vmem:[%s1554_s5 + $0x8] sm:$0xff] (!%p289_p2)   ;;  %v1355_v16 = vld [vmem:[%s1554_s5 + $0x10] sm:$0xff] (!%p289_p2)   ;;  %vm590_vm2 = vcmask (!%p289_p2), 523264   ;;  %vm943_vm3 = vcmask (!%p289_p2), 261120   ;;  %vm1065_vm4 = vcmask (!%p289_p2), 15360  }
   0x8   : > { %1265 = vmatpush3.bf16.msra.mxu1 (!%p289_p2), %v1349_v1  ;;  %1288 = vmatprep.subr.bf16.mxu0 (!%p289_p2), %v1353_v14  ;;  %v1147_v17 = vld [vmem:[%s1551_s2] ss:$0 sm:$0xff] (!%p289_p2) }
   0x9   : > { %1266 = vmatprep.subr.bf16.mxu1 (!%p289_p2), %v1350_v3 }
   0xc   : > { %1267 = vmatpush3.bf16.msra.mxu1 (!%p289_p2), %v1350_v3 }
   0xd   : > { %s1560_s13 = smov (!%p325_p3, %s1143_s13), 31  ;;  %1268 = vmatprep.subr.bf16.mxu1 %v1351_v12 }
   0xe   : > { %s1144_s18 = sshll.u32 %s1560_s13, 2  ;;  %s1146_s25 = sshll.u32 %s1560_s13, 3 }
   0xf   : > { %s328_s21 = scalar_lea.vmem %s1549_s0, %s1144_s18  ;;  %s1512_s10 = scalar_lea.vmem %s1558_s9, %s1146_s25 }
  0x10   : > { %v1341_v4 = vld [vmem:[%s328_s21] sm:$0xff]   ;;  %v1342_v5 = vld [vmem:[%s328_s21 + $0x8] sm:$0xff]   ;;  %v1343_v6 = vld [vmem:[%s328_s21 + $0x10] sm:$0xff]   ;;  %1269 = vmatpush3.bf16.msra.mxu1 %v1351_v12 }
  0x11   : > { %1248 = vmatprep.mubr.msk.bf16.mxu0 %vm401_vm1, %v1341_v4  ;;  %v1344_v7 = vld [vmem:[%s328_s21 + $0x18] sm:$0xff]   ;;  %v1345_v8 = vld [vmem:[%s328_s21 + $0x20] sm:$0xff]   ;;  %v1346_v9 = vld [vmem:[%s328_s21 + $0x28] sm:$0xff]   ;;  %1270 = vmatprep.subr.bf16.mxu1 %v1352_v13 }
  0x12   : > { %1249 = vmatmul.mubr.msk.bf16.vlgmr.msra.gmra.mrb[0].mxu0 %vm401_vm1, %v1342_v5  ;;  %v1347_v10 = vld [vmem:[%s328_s21 + $0x30] sm:$0xff]   ;;  %v1348_v11 = vld [vmem:[%s328_s21 + $0x38] sm:$0xff]   ;;  %v1358_v12 = vld [vmem:[%s1556_s7 + $0x8] sm:$0xff]  }
  0x13   : > { %1252 = vmatprep.mubr.msk.bf16.mxu0 %vm401_vm1, %v1343_v6  ;;  %1289 = vmatpush3.bf16.msra.mxu0 %v1353_v14 }
  0x14   : > { %1271 = vmatpush3.bf16.msra.mxu1 %v1352_v13  ;;  %1290 = vmatprep.subr.bf16.mxu0 %v1354_v15  ;;  %v1164_v13 = vld [vmem:[%s1553_s4] ss:$0 sm:$0xff] }
  0x17   : > { %1291 = vmatpush3.bf16.msra.mxu0 %v1354_v15 }
  0x18   : > { %1292 = vmatprep.subr.bf16.mxu0 %v1355_v16 }
  0x1a   : > { %1253 = vmatmul.mubr.msk.bf16.gmra.mrb[4].mxu0 %vm401_vm1, %v1344_v7 }
  0x1b   : > { %1256 = vmatprep.mubr.msk.bf16.mxu0 %vm401_vm1, %v1345_v8  ;;  %1293 = vmatpush3.bf16.msra.mxu0 %v1355_v16 }
  0x22   : > { %1257 = vmatmul.mubr.msk.bf16.gmra.mrb[8].mxu0 %vm401_vm1, %v1346_v9 }
  0x23   : > { %1260 = vmatprep.mubr.msk.bf16.mxu0 %vm401_vm1, %v1347_v10  ;;  %v1356_v10 = vld [vmem:[%s1554_s5 + $0x18] sm:$0xff]  }
  0x24   : > { %1294 = vmatprep.subr.bf16.mxu0 %v1356_v10 }
  0x25   : > { %1295 = vmatpush3.bf16.msra.mxu0 %v1356_v10 }
  0x2a   : > { %1261 = vmatmul.mubr.msk.bf16.gmra.mrb[12].mxu0 %vm401_vm1, %v1348_v11  ;;  %v1357_v11 = vld [vmem:[%s1556_s7] sm:$0xff]  }
  0x2b   : > { %1312 = vmatprep.subr.bf16.mxu1 %v1357_v11 }
  0xe5   : > { %v1250_v18 = vpop.f32.mrb[0].mxu0 }
  0xe6   : > { %v473_v19 = vadd.f32 %v1250_v18, %v1147_v17  ;;  %v464_v20 = vpop.f32.mrb[1].mxu0 }
  0xe7   : > { %v465_v21 = vadd.f32 %v1147_v17, %v464_v20  ;;  %v1251_v22 = vpop.f32.mrb[2].mxu0 }
  0xe8   : > { %v476_v23 = vadd.f32 %v1251_v22, %v1147_v17  ;;  %v467_v24 = vpop.f32.mrb[3].mxu0  ;;  %v529_v26 = vmax.f32 %v473_v19, 0.0 }
  0xe9   : > { %v468_v25 = vadd.f32 %v1147_v17, %v467_v24  ;;  %v527_v28 = vmax.f32 %v465_v21, 0.0 }
  0xea   : > { %v530_v27 = vmax.f32 %v476_v23, 0.0 }
  0xeb   : > { %v528_v29 = vmax.f32 %v468_v25, 0.0 }
  0xec   : > { %v544_v30 = vpack.c.bf16 %v530_v27, %v529_v26 }
  0xed   : > { %v1254_v31 = vpop.f32.mrb[4].mxu0  ;;  %v543_v32 = vpack.c.bf16 %v528_v29, %v527_v28 }
  0xee   : > { %v489_v33 = vadd.f32 %v1254_v31, %v1147_v17  ;;  %v480_v34 = vpop.f32.mrb[5].mxu0 }
  0xef   : > { %v481_v35 = vadd.f32 %v1147_v17, %v480_v34  ;;  %v1255_v36 = vpop.f32.mrb[6].mxu0  ;;  %1272 = vmatprep.mubr.msk.bf16.mxu1 %vm590_vm2, %v543_v32 }
  0xf0   : > { %v492_v37 = vadd.f32 %v1255_v36, %v1147_v17  ;;  %v483_v38 = vpop.f32.mrb[7].mxu0  ;;  %1273 = vmatmul.mubr.msk.bf16.vlgmr.msra.gmra.mrb[0].mxu1 %vm590_vm2, %v544_v30  ;;  %v533_v40 = vmax.f32 %v489_v33, 0.0 }
  0xf1   : > { %v484_v39 = vadd.f32 %v1147_v17, %v483_v38  ;;  %v531_v42 = vmax.f32 %v481_v35, 0.0  ;;  %1313 = vmatpush3.bf16.msra.mxu1 %v1357_v11 }
  0xf2   : > { %v534_v41 = vmax.f32 %v492_v37, 0.0  ;;  %1314 = vmatprep.subr.bf16.mxu1 %v1358_v12 }
  0xf3   : > { %v532_v43 = vmax.f32 %v484_v39, 0.0 }
  0xf4   : > { %v546_v44 = vpack.c.bf16 %v534_v41, %v533_v40 }
  0xf5   : > { %v545_v45 = vpack.c.bf16 %v532_v43, %v531_v42  ;;  %v1258_v46 = vpop.f32.mrb[8].mxu0  ;;  %1315 = vmatpush3.bf16.msra.mxu1 %v1358_v12 }
  0xf6   : > { %v505_v47 = vadd.f32 %v1258_v46, %v1147_v17  ;;  %v496_v48 = vpop.f32.mrb[9].mxu0 }
  0xf7   : > { %v497_v49 = vadd.f32 %v1147_v17, %v496_v48  ;;  %v1259_v50 = vpop.f32.mrb[10].mxu0  ;;  %1276 = vmatprep.mubr.msk.bf16.mxu1 %vm590_vm2, %v545_v45 }
  0xf8   : > { %v508_v51 = vadd.f32 %v1259_v50, %v1147_v17  ;;  %v499_v52 = vpop.f32.mrb[11].mxu0  ;;  %1277 = vmatmul.mubr.msk.bf16.gmra.mrb[4].mxu1 %vm590_vm2, %v546_v44  ;;  %v537_v54 = vmax.f32 %v505_v47, 0.0 }
  0xf9   : > { %v500_v53 = vadd.f32 %v1147_v17, %v499_v52  ;;  %v535_v56 = vmax.f32 %v497_v49, 0.0 }
  0xfa   : > { %v538_v55 = vmax.f32 %v508_v51, 0.0 }
  0xfb   : > { %v536_v57 = vmax.f32 %v500_v53, 0.0 }
  0xfc   : > { %v548_v58 = vpack.c.bf16 %v538_v55, %v537_v54 }
  0xfd   : > { %v547_v59 = vpack.c.bf16 %v536_v57, %v535_v56  ;;  %v1262_v60 = vpop.f32.mrb[12].mxu0 }
  0xfe   : > { %v521_v61 = vadd.f32 %v1262_v60, %v1147_v17  ;;  %v512_v62 = vpop.f32.mrb[13].mxu0 }
  0xff   : > { %v513_v63 = vadd.f32 %v1147_v17, %v512_v62  ;;  %v1263_v0 = vpop.f32.mrb[14].mxu0  ;;  %1280 = vmatprep.mubr.msk.bf16.mxu1 %vm590_vm2, %v547_v59 }
 0x100   : > { %v524_v1 = vadd.f32 %v1263_v0, %v1147_v17  ;;  %v515_v2 = vpop.f32.mrb[15].mxu0  ;;  %1281 = vmatmul.mubr.msk.bf16.gmra.mrb[8].mxu1 %vm590_vm2, %v548_v58  ;;  %v541_v4 = vmax.f32 %v521_v61, 0.0 }
 0x101   : > { %v516_v3 = vadd.f32 %v1147_v17, %v515_v2  ;;  %v539_v6 = vmax.f32 %v513_v63, 0.0 }
 0x102   : > { %v542_v5 = vmax.f32 %v524_v1, 0.0 }
 0x103   : > { %v540_v7 = vmax.f32 %v516_v3, 0.0 }
 0x104   : > { %v550_v8 = vpack.c.bf16 %v542_v5, %v541_v4 }
 0x105   : > { %v549_v9 = vpack.c.bf16 %v540_v7, %v539_v6  ;;  %v1177_v6 = vld [vmem:[%s1555_s6] ss:$0 sm:$0xff] }
 0x107   : > { %1284 = vmatprep.mubr.msk.bf16.mxu1 %vm590_vm2, %v549_v9 }
 0x108   : > { %1285 = vmatmul.mubr.msk.bf16.gmra.mrb[12].mxu1 %vm590_vm2, %v550_v8 }
 0x1c3   : > { %v1274_v14 = vpop.f32.mrb[0].mxu1 }
 0x1c4   : > { %v658_v15 = vadd.f32 %v1274_v14, %v1164_v13  ;;  %v649_v16 = vpop.f32.mrb[1].mxu1 }
 0x1c5   : > { %v650_v17 = vadd.f32 %v1164_v13, %v649_v16  ;;  %v1275_v18 = vpop.f32.mrb[2].mxu1 }
 0x1c6   : > { %v661_v19 = vadd.f32 %v1275_v18, %v1164_v13  ;;  %v652_v20 = vpop.f32.mrb[3].mxu1  ;;  %v714_v22 = vmax.f32 %v658_v15, 0.0 }
 0x1c7   : > { %v653_v21 = vadd.f32 %v1164_v13, %v652_v20  ;;  %v712_v24 = vmax.f32 %v650_v17, 0.0 }
 0x1c8   : > { %v715_v23 = vmax.f32 %v661_v19, 0.0 }
 0x1c9   : > { %v713_v25 = vmax.f32 %v653_v21, 0.0 }
 0x1ca   : > { %v729_v26 = vpack.c.bf16 %v715_v23, %v714_v22 }
 0x1cb   : > { %v728_v27 = vpack.c.bf16 %v713_v25, %v712_v24  ;;  %v1278_v28 = vpop.f32.mrb[4].mxu1 }
 0x1cc   : > { %v674_v29 = vadd.f32 %v1278_v28, %v1164_v13  ;;  %v665_v30 = vpop.f32.mrb[5].mxu1 }
 0x1cd   : > { %v666_v31 = vadd.f32 %v1164_v13, %v665_v30  ;;  %v1279_v32 = vpop.f32.mrb[6].mxu1  ;;  %1296 = vmatprep.mubr.msk.bf16.mxu0 %vm590_vm2, %v728_v27 }
 0x1ce   : > { %v677_v33 = vadd.f32 %v1279_v32, %v1164_v13  ;;  %v668_v34 = vpop.f32.mrb[7].mxu1  ;;  %1297 = vmatmul.mubr.msk.bf16.vlgmr.msra.gmra.mrb[16].mxu0 %vm590_vm2, %v729_v26  ;;  %v718_v36 = vmax.f32 %v674_v29, 0.0 }
 0x1cf   : > { %v669_v35 = vadd.f32 %v1164_v13, %v668_v34  ;;  %v716_v38 = vmax.f32 %v666_v31, 0.0 }
 0x1d0   : > { %v719_v37 = vmax.f32 %v677_v33, 0.0 }
 0x1d1   : > { %v717_v39 = vmax.f32 %v669_v35, 0.0 }
 0x1d2   : > { %v731_v40 = vpack.c.bf16 %v719_v37, %v718_v36 }
 0x1d3   : > { %v730_v41 = vpack.c.bf16 %v717_v39, %v716_v38  ;;  %v1282_v42 = vpop.f32.mrb[8].mxu1 }
 0x1d4   : > { %v690_v43 = vadd.f32 %v1282_v42, %v1164_v13  ;;  %v681_v44 = vpop.f32.mrb[9].mxu1 }
 0x1d5   : > { %v682_v45 = vadd.f32 %v1164_v13, %v681_v44  ;;  %v1283_v46 = vpop.f32.mrb[10].mxu1  ;;  %1300 = vmatprep.mubr.msk.bf16.mxu0 %vm590_vm2, %v730_v41 }
 0x1d6   : > { %v693_v47 = vadd.f32 %v1283_v46, %v1164_v13  ;;  %v684_v48 = vpop.f32.mrb[11].mxu1  ;;  %1301 = vmatmul.mubr.msk.bf16.gmra.mrb[20].mxu0 %vm590_vm2, %v731_v40  ;;  %v722_v50 = vmax.f32 %v690_v43, 0.0 }
 0x1d7   : > { %v685_v49 = vadd.f32 %v1164_v13, %v684_v48  ;;  %v720_v52 = vmax.f32 %v682_v45, 0.0 }
 0x1d8   : > { %v723_v51 = vmax.f32 %v693_v47, 0.0 }
 0x1d9   : > { %v721_v53 = vmax.f32 %v685_v49, 0.0 }
 0x1da   : > { %v733_v54 = vpack.c.bf16 %v723_v51, %v722_v50 }
 0x1db   : > { %v732_v55 = vpack.c.bf16 %v721_v53, %v720_v52  ;;  %v1286_v56 = vpop.f32.mrb[12].mxu1 }
 0x1dc   : > { %v706_v57 = vadd.f32 %v1286_v56, %v1164_v13  ;;  %v697_v58 = vpop.f32.mrb[13].mxu1 }
 0x1dd   : > { %v698_v59 = vadd.f32 %v1164_v13, %v697_v58  ;;  %v1287_v60 = vpop.f32.mrb[14].mxu1  ;;  %1304 = vmatprep.mubr.msk.bf16.mxu0 %vm590_vm2, %v732_v55 }
 0x1de   : > { %v709_v61 = vadd.f32 %v1287_v60, %v1164_v13  ;;  %v700_v62 = vpop.f32.mrb[15].mxu1  ;;  %1305 = vmatmul.mubr.msk.bf16.gmra.mrb[24].mxu0 %vm590_vm2, %v733_v54  ;;  %v726_v0 = vmax.f32 %v706_v57, 0.0 }
 0x1df   : > { %v701_v63 = vadd.f32 %v1164_v13, %v700_v62  ;;  %v724_v2 = vmax.f32 %v698_v59, 0.0 }
 0x1e0   : > { %v727_v1 = vmax.f32 %v709_v61, 0.0 }
 0x1e1   : > { %v725_v3 = vmax.f32 %v701_v63, 0.0  ;;  %v1190_v63 = vld [vmem:[%s1557_s8] ss:$0 sm:$0xff] }
 0x1e2   : > { %v735_v4 = vpack.c.bf16 %v727_v1, %v726_v0 }
 0x1e3   : > { %v734_v5 = vpack.c.bf16 %v725_v3, %v724_v2 }
 0x1e5   : > { %1308 = vmatprep.mubr.msk.bf16.mxu0 %vm590_vm2, %v734_v5 }
 0x1e6   : > { %1309 = vmatmul.mubr.msk.bf16.gmra.mrb[28].mxu0 %vm590_vm2, %v735_v4 }
 0x2a1   : > { %v1298_v7 = vpop.f32.mrb[16].mxu0 }
 0x2a2   : > { %v842_v8 = vadd.f32 %v1298_v7, %v1177_v6  ;;  %v833_v9 = vpop.f32.mrb[17].mxu0 }
 0x2a3   : > { %v834_v10 = vadd.f32 %v1177_v6, %v833_v9  ;;  %v1299_v11 = vpop.f32.mrb[18].mxu0 }
 0x2a4   : > { %v845_v12 = vadd.f32 %v1299_v11, %v1177_v6  ;;  %v836_v13 = vpop.f32.mrb[19].mxu0  ;;  %v898_v15 = vmax.f32 %v842_v8, 0.0 }
 0x2a5   : > { %v837_v14 = vadd.f32 %v1177_v6, %v836_v13  ;;  %v896_v17 = vmax.f32 %v834_v10, 0.0 }
 0x2a6   : > { %v899_v16 = vmax.f32 %v845_v12, 0.0 }
 0x2a7   : > { %v897_v18 = vmax.f32 %v837_v14, 0.0 }
 0x2a8   : > { %v913_v19 = vpack.c.bf16 %v899_v16, %v898_v15 }
 0x2a9   : > { %v912_v20 = vpack.c.bf16 %v897_v18, %v896_v17  ;;  %v1302_v21 = vpop.f32.mrb[20].mxu0 }
 0x2aa   : > { %v858_v22 = vadd.f32 %v1302_v21, %v1177_v6  ;;  %v849_v23 = vpop.f32.mrb[21].mxu0 }
 0x2ab   : > { %v850_v24 = vadd.f32 %v1177_v6, %v849_v23  ;;  %v1303_v25 = vpop.f32.mrb[22].mxu0  ;;  %1316 = vmatprep.mubr.msk.bf16.mxu1 %vm943_vm3, %v912_v20 }
 0x2ac   : > { %v861_v26 = vadd.f32 %v1303_v25, %v1177_v6  ;;  %v852_v27 = vpop.f32.mrb[23].mxu0  ;;  %1317 = vmatmul.mubr.msk.bf16.vlgmr.msra.gmra.mrb[16].mxu1 %vm943_vm3, %v913_v19  ;;  %v902_v29 = vmax.f32 %v858_v22, 0.0 }
 0x2ad   : > { %v853_v28 = vadd.f32 %v1177_v6, %v852_v27  ;;  %v900_v31 = vmax.f32 %v850_v24, 0.0 }
 0x2ae   : > { %v903_v30 = vmax.f32 %v861_v26, 0.0 }
 0x2af   : > { %v901_v32 = vmax.f32 %v853_v28, 0.0 }
 0x2b0   : > { %v915_v33 = vpack.c.bf16 %v903_v30, %v902_v29 }
 0x2b1   : > { %v914_v34 = vpack.c.bf16 %v901_v32, %v900_v31  ;;  %v1306_v35 = vpop.f32.mrb[24].mxu0 }
 0x2b2   : > { %v874_v36 = vadd.f32 %v1306_v35, %v1177_v6  ;;  %v865_v37 = vpop.f32.mrb[25].mxu0 }
 0x2b3   : > { %v866_v38 = vadd.f32 %v1177_v6, %v865_v37  ;;  %v1307_v39 = vpop.f32.mrb[26].mxu0  ;;  %1320 = vmatprep.mubr.msk.bf16.mxu1 %vm943_vm3, %v914_v34 }
 0x2b4   : > { %v877_v40 = vadd.f32 %v1307_v39, %v1177_v6  ;;  %v868_v41 = vpop.f32.mrb[27].mxu0  ;;  %1321 = vmatmul.mubr.msk.bf16.gmra.mrb[20].mxu1 %vm943_vm3, %v915_v33  ;;  %v906_v43 = vmax.f32 %v874_v36, 0.0 }
 0x2b5   : > { %v869_v42 = vadd.f32 %v1177_v6, %v868_v41  ;;  %v904_v45 = vmax.f32 %v866_v38, 0.0 }
 0x2b6   : > { %v907_v44 = vmax.f32 %v877_v40, 0.0 }
 0x2b7   : > { %v905_v46 = vmax.f32 %v869_v42, 0.0 }
 0x2b8   : > { %v917_v47 = vpack.c.bf16 %v907_v44, %v906_v43 }
 0x2b9   : > { %v916_v48 = vpack.c.bf16 %v905_v46, %v904_v45  ;;  %v1310_v49 = vpop.f32.mrb[28].mxu0 }
 0x2ba   : > { %v890_v50 = vadd.f32 %v1310_v49, %v1177_v6  ;;  %v881_v51 = vpop.f32.mrb[29].mxu0 }
 0x2bb   : > { %v882_v52 = vadd.f32 %v1177_v6, %v881_v51  ;;  %v1311_v53 = vpop.f32.mrb[30].mxu0  ;;  %1324 = vmatprep.mubr.msk.bf16.mxu1 %vm943_vm3, %v916_v48 }
 0x2bc   : > { %v893_v54 = vadd.f32 %v1311_v53, %v1177_v6  ;;  %v884_v55 = vpop.f32.mrb[31].mxu0  ;;  %1325 = vmatmul.mubr.msk.bf16.gmra.mrb[24].mxu1 %vm943_vm3, %v917_v47  ;;  %v910_v57 = vmax.f32 %v890_v50, 0.0 }
 0x2bd   : > { %v885_v56 = vadd.f32 %v1177_v6, %v884_v55  ;;  %v908_v59 = vmax.f32 %v882_v52, 0.0 }
 0x2be   : > { %v911_v58 = vmax.f32 %v893_v54, 0.0 }
 0x2bf   : > { %v909_v60 = vmax.f32 %v885_v56, 0.0 }
 0x2c0   : > { %v919_v61 = vpack.c.bf16 %v911_v58, %v910_v57 }
 0x2c1   : > { %v918_v62 = vpack.c.bf16 %v909_v60, %v908_v59 }
 0x2c3   : > { %1328 = vmatprep.mubr.msk.bf16.mxu1 %vm943_vm3, %v918_v62 }
 0x2c4   : > { %1329 = vmatmul.mubr.msk.bf16.gmra.mrb[28].mxu1 %vm943_vm3, %v919_v61 }
 0x37f   : > { %v1318_v0 = vpop.f32.mrb[16].mxu1 }
 0x380   : > { %v1011_v1 = vadd.f32 %v1318_v0, %v1190_v63  ;;  %v1002_v2 = vpop.f32.mrb[17].mxu1 }
 0x381   : > { %v1003_v3 = vadd.f32 %v1190_v63, %v1002_v2  ;;  %v1319_v4 = vpop.f32.mrb[18].mxu1 }
 0x382   : > { %1068 = vst.msk [vmem:[%s1512_s10 + $0x10] sm:$0xff] %vm1065_vm4, %v1011_v1  ;;  %v1014_v5 = vadd.f32 %v1319_v4, %v1190_v63  ;;  %v1005_v6 = vpop.f32.mrb[19].mxu1 }
 0x383   : > { %1066 = vst.msk [vmem:[%s1512_s10] sm:$0xff] %vm1065_vm4, %v1003_v3  ;;  %v1006_v7 = vadd.f32 %v1190_v63, %v1005_v6 }
 0x384   : > { %1069 = vst.msk [vmem:[%s1512_s10 + $0x18] sm:$0xff] %vm1065_vm4, %v1014_v5 }
 0x385   : > { %1067 = vst.msk [vmem:[%s1512_s10 + $0x8] sm:$0xff] %vm1065_vm4, %v1006_v7 }
 0x387   : > { %v1322_v8 = vpop.f32.mrb[20].mxu1 }
 0x388   : > { %v1027_v9 = vadd.f32 %v1322_v8, %v1190_v63  ;;  %v1018_v10 = vpop.f32.mrb[21].mxu1 }
 0x389   : > { %v1019_v11 = vadd.f32 %v1190_v63, %v1018_v10  ;;  %v1323_v12 = vpop.f32.mrb[22].mxu1 }
 0x38a   : > { %1072 = vst.msk [vmem:[%s1512_s10 + $0x30] sm:$0xff] %vm1065_vm4, %v1027_v9  ;;  %v1030_v13 = vadd.f32 %v1323_v12, %v1190_v63  ;;  %v1021_v14 = vpop.f32.mrb[23].mxu1 }
 0x38b   : > { %1070 = vst.msk [vmem:[%s1512_s10 + $0x20] sm:$0xff] %vm1065_vm4, %v1019_v11  ;;  %v1022_v15 = vadd.f32 %v1190_v63, %v1021_v14 }
 0x38c   : > { %1073 = vst.msk [vmem:[%s1512_s10 + $0x38] sm:$0xff] %vm1065_vm4, %v1030_v13 }
 0x38d   : > { %1071 = vst.msk [vmem:[%s1512_s10 + $0x28] sm:$0xff] %vm1065_vm4, %v1022_v15 }
 0x38f   : > { %v1326_v16 = vpop.f32.mrb[24].mxu1 }
 0x390   : > { %v1043_v17 = vadd.f32 %v1326_v16, %v1190_v63  ;;  %v1034_v18 = vpop.f32.mrb[25].mxu1 }
 0x391   : > { %v1035_v19 = vadd.f32 %v1190_v63, %v1034_v18  ;;  %v1327_v20 = vpop.f32.mrb[26].mxu1 }
 0x392   : > { %1076 = vst.msk [vmem:[%s1512_s10 + $0x50] sm:$0xff] %vm1065_vm4, %v1043_v17  ;;  %v1046_v21 = vadd.f32 %v1327_v20, %v1190_v63  ;;  %v1037_v22 = vpop.f32.mrb[27].mxu1 }
 0x393   : > { %1074 = vst.msk [vmem:[%s1512_s10 + $0x40] sm:$0xff] %vm1065_vm4, %v1035_v19  ;;  %v1038_v23 = vadd.f32 %v1190_v63, %v1037_v22 }
 0x394   : > { %1077 = vst.msk [vmem:[%s1512_s10 + $0x58] sm:$0xff] %vm1065_vm4, %v1046_v21 }
 0x395   : > { %1075 = vst.msk [vmem:[%s1512_s10 + $0x48] sm:$0xff] %vm1065_vm4, %v1038_v23 }
 0x397   : > { %v1330_v24 = vpop.f32.mrb[28].mxu1 }
 0x398   : > { %v1059_v25 = vadd.f32 %v1330_v24, %v1190_v63  ;;  %v1050_v26 = vpop.f32.mrb[29].mxu1 }
 0x399   : > { %v1051_v27 = vadd.f32 %v1190_v63, %v1050_v26  ;;  %v1331_v28 = vpop.f32.mrb[30].mxu1 }
 0x39a   : > { %1080 = vst.msk [vmem:[%s1512_s10 + $0x70] sm:$0xff] %vm1065_vm4, %v1059_v25  ;;  %v1062_v29 = vadd.f32 %v1331_v28, %v1190_v63  ;;  %v1053_v30 = vpop.f32.mrb[31].mxu1 }
 0x39b   : > { %1078 = vst.msk [vmem:[%s1512_s10 + $0x60] sm:$0xff] %vm1065_vm4, %v1051_v27  ;;  %v1054_v31 = vadd.f32 %v1190_v63, %v1053_v30 }
 0x39c   : > { %1081 = vst.msk [vmem:[%s1512_s10 + $0x78] sm:$0xff] %vm1065_vm4, %v1062_v29 }
 0x39d   : > { %1079 = vst.msk [vmem:[%s1512_s10 + $0x68] sm:$0xff] %vm1065_vm4, %v1054_v31 }
 0x39e PF: > { %s19_s30 = sadd.s32 1, %s1365_s30  }
 0x39f   : > { %p16_p4 = scmp.ge.s32.totalorder %s19_s30, 4  }
 0x3a1   :  { %18 = sbr.rel (!%p16_p4) target bundleno = 1 (0x1), region = 86 }

</bundles_post_ra>
